<compile_context>
chip_gen: v6e
topology: v6e:2x2x1
jax: 0.10.0
libtpu: 0.0.40
codegen_flags: <defaults>
</compile_context>

<pallas_src>
import functools

import jax
import jax.numpy as jnp
from jax.experimental import pallas as pl
from jax.experimental.pallas import tpu as pltpu

_LANE = 128      # lane width: every head's class dim is padded to this
_SUBLANE = 8     # sublane width: stacked row count padded to a multiple of this


def _multi_class_loss_kernel(x_ref, y_ref, o_ref, *,
                             c1, c2, c3, o1, o2, n_valid, w1, w2, w3):
    """Fused 3-head mean cross-entropy on stacked rows.

    x_ref: (Rp, 128) f32 logits, rows [0,o1)=head1, [o1,o2)=head2,
           [o2,n_valid)=head3, [n_valid,Rp) zero padding.
    y_ref: (Rp, 1) i32 labels aligned with the rows above.
    """
    x = x_ref[...]                                                  # (Rp, 128)
    labels = y_ref[...]                                             # (Rp, 1)
    rp, lanes = x.shape

    lane = jax.lax.broadcasted_iota(jnp.int32, (rp, lanes), 1)
    row = jax.lax.broadcasted_iota(jnp.int32, (rp, 1), 0)

    # Per-row class count (selects the head) and per-row mean weight.
    nc = jnp.where(row < o1, c1, jnp.where(row < o2, c2, c3))       # (Rp, 1)
    w = jnp.where(row < o1, jnp.float32(w1),
                  jnp.where(row < o2, jnp.float32(w2),
                            jnp.where(row < n_valid, jnp.float32(w3),
                                      jnp.float32(0.0))))           # (Rp, 1)

    lane_valid = lane < nc                                          # (Rp, 128)
    xm = jnp.where(lane_valid, x, jnp.float32(-1e30))               # kill pad lanes
    m = jnp.max(xm, axis=1, keepdims=True)                          # (Rp, 1)
    e = jnp.exp(xm - m)                                             # pad lanes -> 0
    lse = m + jnp.log(jnp.sum(e, axis=1, keepdims=True))            # (Rp, 1)

    picked = jnp.sum(jnp.where(lane == labels, x, jnp.float32(0.0)),
                     axis=1, keepdims=True)                         # logit at label
    nll = lse - picked                                              # (Rp, 1)

    o_ref[0, 0] = jnp.sum(nll * w)                                  # = l1 + l2 + l3


def multi_class_loss(pred1, pred2, pred3, y1, y2, y3):
    """Scalar l1 + l2 + l3, each the mean cross-entropy of (pred_k, y_k)."""
    heads = (pred1, pred2, pred3)
    ys = (y1, y2, y3)
    for k, p in enumerate(heads):
        if p.shape[1] > _LANE:
            raise ValueError(
                f"pred{k + 1} has {p.shape[1]} classes; this kernel supports "
                f"at most {_LANE} classes per head (single-lane-tile LSE).")

    b1, b2, b3 = (p.shape[0] for p in heads)
    rows = b1 + b2 + b3
    rp = max(_SUBLANE, ((rows + _SUBLANE - 1) // _SUBLANE) * _SUBLANE)

    # One stacked logits slab: lane-pad each head to 128, concat rows, row-pad.
    logits = jnp.concatenate(
        [jnp.pad(p.astype(jnp.float32), ((0, 0), (0, _LANE - p.shape[1])))
         for p in heads], axis=0)
    labels = jnp.concatenate([y.astype(jnp.int32) for y in ys], axis=0)[:, None]
    if rp != rows:
        logits = jnp.pad(logits, ((0, rp - rows), (0, 0)))
        labels = jnp.pad(labels, ((0, rp - rows), (0, 0)))

    kernel = functools.partial(
        _multi_class_loss_kernel,
        c1=pred1.shape[1], c2=pred2.shape[1], c3=pred3.shape[1],
        o1=b1, o2=b1 + b2, n_valid=rows,
        w1=1.0 / b1, w2=1.0 / b2, w3=1.0 / b3)

    out = pl.pallas_call(
        kernel,
        out_shape=jax.ShapeDtypeStruct((1, 1), jnp.float32),
        in_specs=[pl.BlockSpec(memory_space=pltpu.MemorySpace.VMEM),
                  pl.BlockSpec(memory_space=pltpu.MemorySpace.VMEM)],
        out_specs=pl.BlockSpec(memory_space=pltpu.MemorySpace.SMEM),
    )(logits, labels)
    return out[0, 0]


if __name__ == "__main__":
    key = jax.random.PRNGKey(0)
    k1, k2, k3, k4, k5, k6 = jax.random.split(key, 6)

    B = 2
    C1, C2, C3 = 6, 5, 4   # action / object / location class counts
    pred1 = jax.random.normal(k1, (B, C1), dtype=jnp.float32)
    pred2 = jax.random.normal(k2, (B, C2), dtype=jnp.float32)
    pred3 = jax.random.normal(k3, (B, C3), dtype=jnp.float32)
    y1 = jax.random.randint(k4, (B,), 0, C1, dtype=jnp.int32)
    y2 = jax.random.randint(k5, (B,), 0, C2, dtype=jnp.int32)
    y3 = jax.random.randint(k6, (B,), 0, C3, dtype=jnp.int32)

    loss = jax.jit(multi_class_loss)(pred1, pred2, pred3, y1, y2, y3)
    jax.block_until_ready(loss)

    # Pure-JAX reference for correctness.
    def ref_ce(p, y):
        logp = jax.nn.log_softmax(p.astype(jnp.float32), axis=-1)
        return -jnp.mean(jnp.take_along_axis(logp, y[:, None], axis=-1))

    expected = ref_ce(pred1, y1) + ref_ce(pred2, y2) + ref_ce(pred3, y3)
    assert loss.shape == ()
    assert jnp.isfinite(loss)
    assert jnp.allclose(loss, expected, rtol=1e-4, atol=1e-4), (loss, expected)
    print("KERNEL_OK")
</pallas_src>

<mosaic_0001>
module attributes {stable_mosaic.version = 11 : i64} {
  func.func @_multi_class_loss_kernel(%arg0: memref<8x128xf32, #tpu.memory_space<vmem>>, %arg1: memref<8x1xi32, #tpu.memory_space<vmem>>, %arg2: memref<1x1xf32, #tpu.memory_space<smem>>) attributes {dimension_semantics = [], scalar_prefetch = 0 : i64, scratch_operands = 0 : i64, tpu.core_type = #tpu.core_type<tc>} {
    %c0 = arith.constant 0 : index
    %c0_0 = arith.constant 0 : index
    %0 = vector.load %arg0[%c0, %c0_0] : memref<8x128xf32, #tpu.memory_space<vmem>>, vector<8x128xf32>
    %c0_1 = arith.constant 0 : index
    %c0_2 = arith.constant 0 : index
    %1 = vector.load %arg1[%c0_1, %c0_2] : memref<8x1xi32, #tpu.memory_space<vmem>>, vector<8x1xi32>
    %2 = tpu.iota {dimensions = array<i32: 1>} : vector<8x128xi32>
    %3 = tpu.iota {dimensions = array<i32: 0>} : vector<8x1xi32>
    %c2_i32 = arith.constant 2 : i32
    %4 = vector.broadcast %c2_i32 : i32 to vector<8x1xi32>
    %5 = arith.cmpi slt, %3, %4 : vector<8x1xi32>
    %c4_i32 = arith.constant 4 : i32
    %6 = vector.broadcast %c4_i32 : i32 to vector<8x1xi32>
    %7 = arith.cmpi slt, %3, %6 : vector<8x1xi32>
    %c5_i32 = arith.constant 5 : i32
    %c4_i32_3 = arith.constant 4 : i32
    %8 = vector.broadcast %c5_i32 : i32 to vector<8x1xi32>
    %9 = vector.broadcast %c4_i32_3 : i32 to vector<8x1xi32>
    %10 = arith.select %7, %8, %9 : vector<8x1xi1>, vector<8x1xi32>
    %c6_i32 = arith.constant 6 : i32
    %11 = vector.broadcast %c6_i32 : i32 to vector<8x1xi32>
    %12 = arith.select %5, %11, %10 : vector<8x1xi1>, vector<8x1xi32>
    %c2_i32_4 = arith.constant 2 : i32
    %13 = vector.broadcast %c2_i32_4 : i32 to vector<8x1xi32>
    %14 = arith.cmpi slt, %3, %13 : vector<8x1xi32>
    %c4_i32_5 = arith.constant 4 : i32
    %15 = vector.broadcast %c4_i32_5 : i32 to vector<8x1xi32>
    %16 = arith.cmpi slt, %3, %15 : vector<8x1xi32>
    %c6_i32_6 = arith.constant 6 : i32
    %17 = vector.broadcast %c6_i32_6 : i32 to vector<8x1xi32>
    %18 = arith.cmpi slt, %3, %17 : vector<8x1xi32>
    %cst = arith.constant 5.000000e-01 : f32
    %cst_7 = arith.constant 0.000000e+00 : f32
    %19 = vector.broadcast %cst : f32 to vector<8x1xf32>
    %20 = vector.broadcast %cst_7 : f32 to vector<8x1xf32>
    %21 = arith.select %18, %19, %20 : vector<8x1xi1>, vector<8x1xf32>
    %cst_8 = arith.constant 5.000000e-01 : f32
    %22 = vector.broadcast %cst_8 : f32 to vector<8x1xf32>
    %23 = arith.select %16, %22, %21 : vector<8x1xi1>, vector<8x1xf32>
    %cst_9 = arith.constant 5.000000e-01 : f32
    %24 = vector.broadcast %cst_9 : f32 to vector<8x1xf32>
    %25 = arith.select %14, %24, %23 : vector<8x1xi1>, vector<8x1xf32>
    %26 = vector.broadcast %12 : vector<8x1xi32> to vector<8x128xi32>
    %27 = arith.cmpi slt, %2, %26 : vector<8x128xi32>
    %cst_10 = arith.constant -1.000000e+30 : f32
    %28 = vector.broadcast %cst_10 : f32 to vector<8x128xf32>
    %29 = arith.select %27, %0, %28 : vector<8x128xi1>, vector<8x128xf32>
    %cst_11 = arith.constant dense<0xFF800000> : vector<8xf32>
    %30 = vector.multi_reduction <maximumf>, %29, %cst_11 [1] : vector<8x128xf32> to vector<8xf32>
    %31 = vector.shape_cast %30 : vector<8xf32> to vector<8x1xf32>
    %32 = vector.broadcast %31 : vector<8x1xf32> to vector<8x128xf32>
    %33 = arith.subf %29, %32 : vector<8x128xf32>
    %34 = math.exp %33 : vector<8x128xf32>
    %cst_12 = arith.constant dense<0.000000e+00> : vector<8xf32>
    %35 = vector.multi_reduction <add>, %34, %cst_12 [1] : vector<8x128xf32> to vector<8xf32>
    %36 = vector.shape_cast %35 : vector<8xf32> to vector<8x1xf32>
    %37 = math.log %36 : vector<8x1xf32>
    %38 = arith.addf %31, %37 : vector<8x1xf32>
    %39 = vector.broadcast %1 : vector<8x1xi32> to vector<8x128xi32>
    %40 = arith.cmpi eq, %2, %39 : vector<8x128xi32>
    %cst_13 = arith.constant 0.000000e+00 : f32
    %41 = vector.broadcast %cst_13 : f32 to vector<8x128xf32>
    %42 = arith.select %40, %0, %41 : vector<8x128xi1>, vector<8x128xf32>
    %cst_14 = arith.constant dense<0.000000e+00> : vector<8xf32>
    %43 = vector.multi_reduction <add>, %42, %cst_14 [1] : vector<8x128xf32> to vector<8xf32>
    %44 = vector.shape_cast %43 : vector<8xf32> to vector<8x1xf32>
    %45 = arith.subf %38, %44 : vector<8x1xf32>
    %46 = arith.mulf %45, %25 : vector<8x1xf32>
    %47 = vector.shape_cast %46 : vector<8x1xf32> to vector<1x8x1xf32>
    %cst_15 = arith.constant dense<0.000000e+00> : vector<1xf32>
    %48 = vector.multi_reduction <add>, %47, %cst_15 [1, 2] : vector<1x8x1xf32> to vector<1xf32>
    %49 = vector.shape_cast %48 : vector<1xf32> to vector<1x1x1xf32>
    %50 = vector.extract %49[0, 0, 0] : f32 from vector<1x1x1xf32>
    %c0_16 = arith.constant 0 : index
    %c0_17 = arith.constant 0 : index
    %51 = memref.load %arg2[%c0_16, %c0_17] : memref<1x1xf32, #tpu.memory_space<smem>>
    memref.store %50, %arg2[%c0_16, %c0_17] : memref<1x1xf32, #tpu.memory_space<smem>>
    return
  }
}

</mosaic_0001>

<bundles_post_ra>
// kernel: multi_class_loss.1
= control target key start
LH: loop header
LB: loop body
LE: loop exit
PB: predicated region body
PF: predicated region fallthrough
CT: control target
= control target key end

     0   :  { %v14_v0 = vlaneseq  ;;  %s126_s0 = inlined_call_operand.vmem [shape: f32[8,128], index: 0, kind: input, shape index: {}]   ;;  %s127_s1 = inlined_call_operand.vmem [shape: s32[8,1], index: 1, kind: input, shape index: {}]   ;;  %s128_s2 = inlined_call_operand.hbm [shape: f32[1,1], index: 2, kind: output, shape index: {}]  }
   0x1   :  { %7 = vsyncpa [#allocation3], 0  ;;  %v94_v1 = vmov 0   ;;  %v12_v4 = vld [vmem:[%s126_s0] sm:$0xff]  ;;  %v95_v5 = vmov 4   ;;  %v96_v17 = vmov 0.0  }
   0x2   :  { %79 = vset.pattern.permute.xlu0 %v94_v1  ;;  %v17_v2 = vshrl.u32 %v14_v0, 7  ;;  %v15_v3 = vand.u32 127, %v14_v0  ;;  %v13_v9 = vld [vmem:[%s127_s1] sm:$0xff]  ;;  %vm47_vm5 = vcmask 7168   ;;  %s97_s1 = smov [#allocation2]  }
   0x4   :  { %vm18_vm0 = vcmp.lt.s32.totalorder %v17_v2, 2  ;;  %vm19_vm1 = vcmp.lt.s32.totalorder %v17_v2, 4  ;;  %vm22_vm4 = vcmp.lt.s32.totalorder %v17_v2, 6 }
   0x5   :  { %v20_v6 = vsel %vm19_vm1, 5, %v95_v5  ;;  %v23_v18 = vsel %vm22_vm4, 0.5, %v96_v17 }
   0x6   :  { %v21_v7 = vsel %vm18_vm0, 6, %v20_v6  ;;  %v24_v21 = vsel %vm19_vm1, 0.5, %v23_v18 }
   0x7   :  { %vm26_vm2 = vcmp.lt.s32.totalorder %v15_v3, %v21_v7  ;;  %v25_v24 = vsel %vm18_vm0, 0.5, %v24_v21 }
   0x8   :  { %v27_v8 = vsel %vm26_vm2, %v12_v4, -1e+30 }
   0x9   :  { %28 = vmax.xlane.f32.xlu0 %v27_v8 }
  0x1f   :  { %39 = vperm.xlu0 %79, %v13_v9  }
  0x92   :  { %v29_v10 = vpop.xlane.xlu0 %28 }
  0x93   :  { %v30_v11 = vsub.f32 %v27_v8, %v29_v10 }
  0x95   :  { %v31_v12 = vmul.f32 1.442695, %v30_v11 }
  0x97   :  { %80 = vpow2.f32 %v31_v12 }
  0x9a   :  { %v40_v13 = vpop.permute.xlu0 %39 }
  0x9b   :  { %vm41_vm3 = vcmp.eq.s32.totalorder %v15_v3, %v40_v13 }
  0x9c   :  { %v42_v15 = vsel %vm41_vm3, %v12_v4, 0.0 }
  0xa4   :  { %v81_v14 = vpop.eup %80 }
  0xa5   :  { %33 = vadd.xlane.f32.xlu1 %v81_v14 }
  0xa9   :  { %43 = vadd.xlane.f32.xlu1 %v42_v15 }
 0x12e   :  { %v34_v16 = vpop.xlane.xlu1 %33 }
 0x12f   :  { %82 = vlog2.f32 %v34_v16 }
 0x132   :  { %v44_v22 = vpop.xlane.xlu1 %43 }
 0x13c   :  { %v83_v19 = vpop.eup %82 }
 0x13d   :  { %v36_v20 = vmul.f32 0.6931472, %v83_v19 }
 0x13f   :  { %v37_v23 = vadd.f32 %v36_v20, %v29_v10 }
 0x141   :  { %v45_v25 = vsub.f32 %v37_v23, %v44_v22 }
 0x143   :  { %v46_v26 = vmul.f32 %v45_v25, %v25_v24 }
 0x145   :  { %v48_v27 = vsel %vm47_vm5, %v46_v26, 0.0 }
 0x146   :  { %49 = vadd.xlane.f32.xlu1 %v48_v27 }
 0x1cf   :  { %v50_v28 = vpop.xlane.xlu1 %49 }
 0x1d0   :  { %v51_v29 = vrot.slane %v50_v28, 4 }
 0x1d2   :  { %v52_v30 = vadd.f32 %v51_v29, %v50_v28 }
 0x1d4   :  { %v53_v31 = vrot.slane %v52_v30, 2 }
 0x1d6   :  { %v54_v32 = vadd.f32 %v53_v31, %v52_v30 }
 0x1d8   :  { %v55_v33 = vrot.slane %v54_v32, 1 }
 0x1da   :  { %v56_v34 = vadd.f32 %v55_v33, %v54_v32 }
 0x1dc   :  { %73 = vpush %v56_v34 }
 0x20d   :  { %s74_s0 = spop %73 }
 0x20e   :  { %59 = sst [smem:[#allocation2]] %s74_s0 }
 0x20f   :  { %67 = dma.smem_to_hbm %s97_s1, 16, %s128_s2, [#allocation3]  }
 0x210   :  { %92 = dma.done.wait [#allocation3], 16  }
 0x211   :  { %93 = vsyncadd [#allocation3], 4294967280 }
 0x212   :  { %71 = sfence }
 0x213   :  { %72 = vsyncpa [#allocation3], 1 }

</bundles_post_ra>
